<compile_context>
chip_gen: v7x
topology: tpu7x:2x2x1
jax: 0.10.0
libtpu: 0.0.40
codegen_flags: <defaults>
</compile_context>

<pallas_src>
import jax
import jax.numpy as jnp
from jax.experimental import pallas as pl
from jax.experimental.pallas import tpu as pltpu

_LANES = 128                 # lane width of a vreg: last dim maps exactly here
_TILE_ROWS = 4096            # 4096 x 128 f32 = 2 MiB per block (cap)
_SMALL_ROW_LIMIT = 256       # <= 128 KiB f32: single un-gridded block (launch-bound)
_MIN_GRID_STEPS = 4          # keep >= 4 pipelined steps (also feeds both v7x TCs)


def _mul_kernel(x_ref, o_ref):
    # Elementwise hot path: VPU multiply by constant 0.5.
    o_ref[...] = x_ref[...] * jnp.asarray(0.5, dtype=x_ref.dtype)


def _cost(n_elems: int, itemsize: int) -> pl.CostEstimate:
    # 1 mul per element, read + write every byte once, no transcendentals.
    return pl.CostEstimate(
        flops=n_elems,
        transcendentals=0,
        bytes_accessed=2 * n_elems * itemsize,
    )


def _mul_single_block(x2d: jax.Array) -> jax.Array:
    # Whole array as one VMEM block, no grid: removes pipeline scaffolding for
    # tiny, launch/DMA-overhead-bound problems (<= 128 KiB).
    return pl.pallas_call(
        _mul_kernel,
        out_shape=jax.ShapeDtypeStruct(x2d.shape, x2d.dtype),
        cost_estimate=_cost(x2d.size, x2d.dtype.itemsize),
    )(x2d)


def _mul_tiled(x2d: jax.Array) -> jax.Array:
    # HBM-bandwidth-bound path: lane-dense 128-wide columns, large row tiles,
    # parallel grid axis, partial last block masked by Pallas (no pad/slice).
    rows, cols = x2d.shape

    # Adaptive tile height: at least _MIN_GRID_STEPS grid steps so the
    # pipeline overlaps and both v7x TensorCores participate; capped at
    # _TILE_ROWS (2 MiB f32) so the double-buffered in+out footprint (4x block
    # = 8 MiB) stays under every generation's scoped-VMEM budget.
    tile_rows = min(_TILE_ROWS, pl.cdiv(rows, _MIN_GRID_STEPS))
    tile_rows = max(8, ((tile_rows + 7) // 8) * 8)  # sublane (8) aligned

    grid = (pl.cdiv(rows, tile_rows),)

    # TODO(synk): if xprof on v7x still shows exposed input DMA at these tile
    # sizes, sweep pipeline_mode=pl.Buffered(3) on the input BlockSpec.
    return pl.pallas_call(
        _mul_kernel,
        out_shape=jax.ShapeDtypeStruct((rows, cols), x2d.dtype),
        grid_spec=pl.GridSpec(
            grid=grid,
            in_specs=[pl.BlockSpec((tile_rows, cols), lambda i: (i, 0))],
            out_specs=pl.BlockSpec((tile_rows, cols), lambda i: (i, 0)),
        ),
        compiler_params=pltpu.CompilerParams(
            dimension_semantics=("parallel",),
        ),
        cost_estimate=_cost(rows * cols, x2d.dtype.itemsize),
    )(x2d)


def mulnet_forward(x: jax.Array) -> jax.Array:
    """Forward pass of MulNet: y = x * 0.5."""
    # torch.mul(int_or_bool_tensor, 0.5) promotes to float; mirror that here so
    # the in-kernel constant 0.5 never rounds to 0.
    if not jnp.issubdtype(x.dtype, jnp.floating):
        x = x.astype(jnp.float32)

    orig_shape = x.shape
    n = x.size
    flat = x.reshape(-1)  # reshape of contiguous array: metadata only

    # Ragged tail (< 128 elements): handle in plain JAX instead of padding the
    # whole array (jnp.pad + slice-back would each be a full-array HBM copy).
    rem = n % _LANES
    main_n = n - rem
    tail_out = None
    if rem:
        tail_out = flat[main_n:] * jnp.asarray(0.5, dtype=flat.dtype)
        flat = flat[:main_n]

    if main_n == 0:
        out_flat = tail_out
    else:
        rows = main_n // _LANES
        x2d = flat.reshape(rows, _LANES)
        if rows <= _SMALL_ROW_LIMIT:
            out2d = _mul_single_block(x2d)
        else:
            out2d = _mul_tiled(x2d)
        out_flat = out2d.reshape(-1)
        if tail_out is not None:
            out_flat = jnp.concatenate([out_flat, tail_out])

    return out_flat.reshape(orig_shape)


if __name__ == "__main__":
    key = jax.random.PRNGKey(0)
    # NCHW input consistent with the test model: batch=2, C=4, H=W=16.
    x = jax.random.normal(key, (2, 4, 16, 16), dtype=jnp.float32)

    y = mulnet_forward(x)
    y = jax.block_until_ready(y)

    # Verify against the trivial reference.
    ref = x * 0.5
    assert y.shape == x.shape and y.dtype == x.dtype
    assert jnp.allclose(y, ref, rtol=1e-6, atol=1e-6)

    print("KERNEL_OK")
</pallas_src>

<mosaic_0001>
module attributes {stable_mosaic.version = 11 : i64} {
  func.func @_mul_kernel(%arg0: memref<16x128xf32, #tpu.memory_space<vmem>>, %arg1: memref<16x128xf32, #tpu.memory_space<vmem>>) attributes {dimension_semantics = [], scalar_prefetch = 0 : i64, scratch_operands = 0 : i64, tpu.core_type = #tpu.core_type<tc>} {
    %c0 = arith.constant 0 : index
    %c0_0 = arith.constant 0 : index
    %0 = vector.load %arg0[%c0, %c0_0] : memref<16x128xf32, #tpu.memory_space<vmem>>, vector<16x128xf32>
    %cst = arith.constant 5.000000e-01 : f32
    %1 = vector.broadcast %cst : f32 to vector<16x128xf32>
    %2 = arith.mulf %0, %1 : vector<16x128xf32>
    %c0_1 = arith.constant 0 : index
    %c0_2 = arith.constant 0 : index
    %3 = vector.load %arg1[%c0_1, %c0_2] : memref<16x128xf32, #tpu.memory_space<vmem>>, vector<16x128xf32>
    tpu.vector_store %arg1[%c0_1, %c0_2], %2 {strides = array<i32>} : memref<16x128xf32, #tpu.memory_space<vmem>>, vector<16x128xf32>,
    return
  }
}

</mosaic_0001>

<bundles_post_ra>
// kernel: tpu_custom_call.1
= control target key start
LH: loop header
LB: loop body
LE: loop exit
PB: predicated region body
PF: predicated region fallthrough
CT: control target
= control target key end

     0   :  { %6 = vsyncpa [#allocation3], 0  ;;  %s136_s0 = inlined_call_operand.hbm [shape: f32[16,128], index: 0, kind: input, shape index: {}]   ;;  %s137_s1 = inlined_call_operand.hbm [shape: f32[16,128], index: 1, kind: output, shape index: {}]  }
   0x1   :  { %7 = vsyncpa [#allocation4], 0  ;;  %s98_s6 = smov [#allocation2]   ;;  %s50_s10 = scalar_lea.hbm %s136_s0, 256 }
   0x2   :  { %s13_s7 = sshll.u32 %s98_s6, 4  ;;  %p51_p0 = scmp.ne.s32.totalorder %s136_s0, %s50_s10  ;;  %s14_s7 = int_to_ptr.vmem [resolvable:$true] %s13_s7 }
   0x3   :  { %p54_p1 = scmp.lt.u32.totalorder %s50_s10, %s136_s0 }
   0x5   :  { %p56_p2 = pnand %p54_p1, %p51_p0 }
   0x7   :  { %59 = shalt.err (!%p56_p2)
}
   0x8   :  { %s60_s15 = scalar_lea.vmem %s14_s7, 256  ;;  %p65_p4 = scmp.lt.s32.totalorder %s14_s7, %s14_s7 }
   0x9   :  { %p61_p3 = scmp.ne.s32.totalorder %s14_s7, %s60_s15  ;;  %p66_p5 = scmp.lt.s32.totalorder %s60_s15, %s60_s15 }
   0xb   :  { %p67_p6 = por %p66_p5, %p65_p4 }
   0xd   :  { %p68_p7 = pnand %p67_p6, %p61_p3 }
   0xf   :  { %71 = shalt.err (!%p68_p7)
}
  0x10   :  { %s99_s16 = smov 128   ;;  %s100_s17 = smov 8  }
  0x11   :  { %19 = dma.hbm_to_vmem [thread:$0]  %s136_s0, 256, %s14_s7, [#allocation3], %s99_s16, %s99_s16, %s100_s17  }
  0x12   :  { %94 = dma.done.wait [#allocation3], 256  }
  0x13   :  { %95 = vsyncadd [#allocation3], 4294967040  ;;  %s101_s20 = smov [#allocation5]   ;;  %v23_v0 = vld [vmem:[#allocation2] sm:$0xff]  ;;  %v24_v1 = vld [vmem:[#allocation2 + $0x8] sm:$0xff] }
  0x14   :  { %s34_s21 = sshll.u32 %s101_s20, 4  ;;  %v25_v2 = vmul.f32 0.5, %v23_v0  ;;  %v26_v3 = vmul.f32 0.5, %v24_v1  ;;  %s35_s21 = int_to_ptr.vmem [resolvable:$true] %s34_s21 }
  0x15   :  { %s72_s22 = scalar_lea.vmem %s35_s21, 256  ;;  %p77_p9 = scmp.lt.s32.totalorder %s35_s21, %s35_s21 }
  0x16   :  { %27 = vst [vmem:[#allocation5] sm:$0xff] %v25_v2  ;;  %28 = vst [vmem:[#allocation5 + $0x8] sm:$0xff] %v26_v3  ;;  %p73_p8 = scmp.ne.s32.totalorder %s35_s21, %s72_s22  ;;  %p78_p10 = scmp.lt.s32.totalorder %s72_s22, %s72_s22 }
  0x18   :  { %p79_p11 = por %p78_p10, %p77_p9 }
  0x1a   :  { %p80_p12 = pnand %p79_p11, %p73_p8 }
  0x1c   :  { %83 = shalt.err (!%p80_p12)
}
  0x1d   :  { %s84_s24 = scalar_lea.hbm %s137_s1, 256 }
  0x1e   :  { %p85_p13 = scmp.ne.s32.totalorder %s137_s1, %s84_s24  ;;  %p88_p0 = scmp.lt.u32.totalorder %s84_s24, %s137_s1 }
  0x20   :  { %p90_p1 = pnand %p88_p0, %p85_p13 }
  0x22   :  { %93 = shalt.err (!%p90_p1)
}
  0x23   :  { %40 = dma.vmem_to_hbm [thread:$0]  %s35_s21, 256, %s137_s1, [#allocation4], %s99_s16, %s99_s16, %s100_s17  }
  0x24   :  { %96 = dma.done.wait [#allocation4], 256  }
  0x25   :  { %97 = vsyncadd [#allocation4], 4294967040 }
  0x26   :  { %44 = vsyncpa [#allocation3], 1 }
  0x27   :  { %45 = vsyncpa [#allocation4], 1 }

</bundles_post_ra>
